<compile_context>
chip_gen: v7x
topology: tpu7x:2x2x1
jax: 0.10.0
libtpu: 0.0.40
codegen_flags: <defaults>
</compile_context>

<pallas_src>
import math

import jax
import jax.numpy as jnp
from jax.experimental import pallas as pl
from jax.experimental.pallas import tpu as pltpu

# Whole-array-in-VMEM block spec (shapes are tiny; no grid tiling needed).
VMEM_SPEC = pl.BlockSpec(memory_space=pltpu.MemorySpace.VMEM)


def _net_fused_kernel(lhs_ref, wb_ref, brow_ref, wfx_ref, mask_ref,
                      rsel_ref, csel_ref, bf_ref, o_ref):
    # lhs_ref : (2*N*C, H2*W)   rows = (h-parity, n, c), cols = (h2, w)
    # wb_ref  : (H2*W, 2*H2*Fp) linear1 weight, block-diagonal over h2;
    #                           cols = (f-parity, h2, f2)
    # brow_ref: (1, 2*H2*Fp)    linear1 bias per (f-parity, h2, f2) column
    # wfx_ref : (H2*Fp, K*C)    fc1 weight, rows = (h2, f2), cols = (k, c')
    # mask_ref: (N*C, K*C)      1.0 where row-c == col-c'
    # rsel_ref: (N, N*C)        0/1 selector: sums the C rows of each sample
    # csel_ref: (K*C, K)        0/1 selector: sums the C cols of each k
    # bf_ref  : (1, K);  o_ref : (N, K)

    # linear1 for all four 2x2 pooling-window corners: ONE MXU matmul.
    y = jnp.dot(lhs_ref[...], wb_ref[...],
                preferred_element_type=jnp.float32)              # (2*N*C, 2*H2*Fp)

    # MaxPool2d(2, 2):
    #   H pair      -> max of top/bottom row halves (sublane-tile aligned)
    #   feature pair-> max of left/right column halves
    # (bias is constant within each H pair, so adding it after the H-max is
    #  equivalent to the reference's "bias before pooling"; it differs between
    #  the feature-parity halves, so it is added before the feature max.)
    half_rows = y.shape[0] // 2
    yh = jnp.maximum(y[:half_rows, :], y[half_rows:, :]) + brow_ref[...]
    half_cols = yh.shape[1] // 2
    pooled = jnp.maximum(yh[:, :half_cols], yh[:, half_cols:])   # (N*C, H2*Fp)

    # fc1 (512 -> 7) + relu, entirely on the MXU:
    u = jnp.dot(pooled, wfx_ref[...],
                preferred_element_type=jnp.float32)              # (N*C, K*C)
    v = u * mask_ref[...]                                        # keep c == c'
    s = jnp.dot(v, csel_ref[...],
                preferred_element_type=jnp.float32)              # (N*C, K)
    o = jnp.dot(rsel_ref[...], s,
                preferred_element_type=jnp.float32)              # (N, K)
    o_ref[...] = jnp.maximum(o + bf_ref[...], 0.0)


def net_forward(x, w1, b1, wf, bf):
    N, C, H, W = x.shape              # (2, 8, 16, 6)
    F1 = w1.shape[0]                  # 16
    K = wf.shape[0]                   # 7
    H2, Fp = H // 2, F1 // 2          # 8, 8
    f32 = jnp.float32

    # ---- layout prep: all wrapper-side (weight-side pieces fold into
    #      constants in a real deployment); no in-kernel relayouts needed ----
    # lhs rows = (h-parity, n, c), cols = (h2, w): the even/odd-H split happens
    # here, so the kernel never lane-slices the input.
    lhs = jnp.transpose(x.reshape(N, C, H2, 2, W),
                        (3, 0, 1, 2, 4)).reshape(2 * N * C, H2 * W)      # (32, 48)

    # linear1 weight block-diagonal over h2, even/odd feature halves side by side.
    w_e, w_o = w1[0::2], w1[1::2]                                        # (Fp, W)
    eye_h = jnp.eye(H2, dtype=f32)
    wb = jnp.concatenate([jnp.kron(eye_h, w_e.T),
                          jnp.kron(eye_h, w_o.T)], axis=1)               # (48, 128)
    brow = jnp.concatenate([jnp.tile(b1[0::2], H2),
                            jnp.tile(b1[1::2], H2)]).reshape(1, 2 * H2 * Fp)

    # fc1 weight with rows = (h2, f2) (matches pooled columns) and cols = (k, c').
    wfx = wf.reshape(K, C, H2, Fp).transpose(2, 3, 0, 1).reshape(H2 * Fp, K * C)

    # c == c' mask and the two 0/1 block-sum selectors.
    mask = (jnp.arange(N * C)[:, None] % C ==
            jnp.arange(K * C)[None, :] % C).astype(f32)                  # (16, 56)
    rsel = jnp.kron(jnp.eye(N, dtype=f32), jnp.ones((1, C), f32))        # (2, 16)
    csel = jnp.kron(jnp.eye(K, dtype=f32), jnp.ones((C, 1), f32))        # (56, 7)
    bf2 = bf.reshape(1, K)

    return pl.pallas_call(
        _net_fused_kernel,
        out_shape=jax.ShapeDtypeStruct((N, K), jnp.float32),
        in_specs=[VMEM_SPEC] * 8,
        out_specs=VMEM_SPEC,
    )(lhs, wb, brow, wfx, mask, rsel, csel, bf2)


def _reference(x, w1, b1, wf, bf):
    # Pure-JAX reference of the same (repaired) semantics.
    h = jnp.einsum("nchw,fw->nchf", x, w1) + b1
    N, C, H, F = h.shape
    p = jnp.max(h.reshape(N, C, H // 2, 2, F // 2, 2), axis=(3, 5))
    flat = p.reshape(N, -1)
    return jnp.maximum(flat @ wf.T + bf, 0.0)


if __name__ == "__main__":
    key = jax.random.PRNGKey(0)
    kx, k1, k2, k3, k4 = jax.random.split(key, 5)

    N, C, H, W = 2, 8, 16, 6
    x = jax.random.normal(kx, (N, C, H, W), jnp.float32)

    # nn.Linear(6, 16): weight (16, 6), bias (16)  (uniform +-1/sqrt(fan_in))
    lim1 = 1.0 / math.sqrt(6.0)
    w1 = jax.random.uniform(k1, (16, 6), jnp.float32, -lim1, lim1)
    b1 = jax.random.uniform(k2, (16,), jnp.float32, -lim1, lim1)

    # nn.Linear(512, 7): weight (7, 512), bias (7)
    limf = 1.0 / math.sqrt(512.0)
    wf = jax.random.uniform(k3, (7, 512), jnp.float32, -limf, limf)
    bf = jax.random.uniform(k4, (7,), jnp.float32, -limf, limf)

    out = jax.jit(net_forward)(x, w1, b1, wf, bf)
    out = jax.block_until_ready(out)

    ref = _reference(x, w1, b1, wf, bf)
    assert out.shape == (N, 7) and out.dtype == jnp.float32
    assert jnp.allclose(out, ref, atol=1e-4, rtol=1e-4), "mismatch vs JAX reference"
    print("KERNEL_OK")
</pallas_src>

<mosaic_0001>
module attributes {stable_mosaic.version = 11 : i64} {
  func.func @_net_fused_kernel(%arg0: memref<32x48xf32, #tpu.memory_space<vmem>>, %arg1: memref<48x128xf32, #tpu.memory_space<vmem>>, %arg2: memref<1x128xf32, #tpu.memory_space<vmem>>, %arg3: memref<64x56xf32, #tpu.memory_space<vmem>>, %arg4: memref<16x56xf32, #tpu.memory_space<vmem>>, %arg5: memref<2x16xf32, #tpu.memory_space<vmem>>, %arg6: memref<56x7xf32, #tpu.memory_space<vmem>>, %arg7: memref<1x7xf32, #tpu.memory_space<vmem>>, %arg8: memref<2x7xf32, #tpu.memory_space<vmem>>) attributes {dimension_semantics = [], scalar_prefetch = 0 : i64, scratch_operands = 0 : i64, tpu.core_type = #tpu.core_type<tc>} {
    %c0 = arith.constant 0 : index
    %c0_0 = arith.constant 0 : index
    %0 = vector.load %arg0[%c0, %c0_0] : memref<32x48xf32, #tpu.memory_space<vmem>>, vector<32x48xf32>
    %c0_1 = arith.constant 0 : index
    %c0_2 = arith.constant 0 : index
    %1 = vector.load %arg1[%c0_1, %c0_2] : memref<48x128xf32, #tpu.memory_space<vmem>>, vector<48x128xf32>
    %cst = arith.constant dense<0.000000e+00> : vector<32x128xf32>
    %2 = tpu.matmul %0, %1, %cst {dimension_numbers = #tpu.dot_dimension_numbers<[1], [0], [0], [1], [0, 0, 1, 1], [], []>} : vector<32x48xf32>, vector<48x128xf32>, vector<32x128xf32> -> vector<32x128xf32>
    %3 = vector.extract_strided_slice %2 {offsets = [0, 0], sizes = [16, 128], strides = [1, 1]} : vector<32x128xf32> to vector<16x128xf32>
    %4 = vector.extract_strided_slice %2 {offsets = [16, 0], sizes = [16, 128], strides = [1, 1]} : vector<32x128xf32> to vector<16x128xf32>
    %5 = arith.maximumf %3, %4 : vector<16x128xf32>
    %c0_3 = arith.constant 0 : index
    %c0_4 = arith.constant 0 : index
    %6 = vector.load %arg2[%c0_3, %c0_4] : memref<1x128xf32, #tpu.memory_space<vmem>>, vector<1x128xf32>
    %7 = vector.broadcast %6 : vector<1x128xf32> to vector<16x128xf32>
    %8 = arith.addf %5, %7 : vector<16x128xf32>
    %9 = vector.extract_strided_slice %8 {offsets = [0, 0], sizes = [16, 64], strides = [1, 1]} : vector<16x128xf32> to vector<16x64xf32>
    %10 = vector.extract_strided_slice %8 {offsets = [0, 64], sizes = [16, 64], strides = [1, 1]} : vector<16x128xf32> to vector<16x64xf32>
    %11 = arith.maximumf %9, %10 : vector<16x64xf32>
    %c0_5 = arith.constant 0 : index
    %c0_6 = arith.constant 0 : index
    %12 = vector.load %arg3[%c0_5, %c0_6] : memref<64x56xf32, #tpu.memory_space<vmem>>, vector<64x56xf32>
    %cst_7 = arith.constant dense<0.000000e+00> : vector<16x56xf32>
    %13 = tpu.matmul %11, %12, %cst_7 {dimension_numbers = #tpu.dot_dimension_numbers<[1], [0], [0], [1], [0, 0, 1, 1], [], []>} : vector<16x64xf32>, vector<64x56xf32>, vector<16x56xf32> -> vector<16x56xf32>
    %c0_8 = arith.constant 0 : index
    %c0_9 = arith.constant 0 : index
    %14 = vector.load %arg4[%c0_8, %c0_9] : memref<16x56xf32, #tpu.memory_space<vmem>>, vector<16x56xf32>
    %15 = arith.mulf %13, %14 : vector<16x56xf32>
    %c0_10 = arith.constant 0 : index
    %c0_11 = arith.constant 0 : index
    %16 = vector.load %arg6[%c0_10, %c0_11] : memref<56x7xf32, #tpu.memory_space<vmem>>, vector<56x7xf32>
    %cst_12 = arith.constant dense<0.000000e+00> : vector<16x7xf32>
    %17 = tpu.matmul %15, %16, %cst_12 {dimension_numbers = #tpu.dot_dimension_numbers<[1], [0], [0], [1], [0, 0, 1, 1], [], []>} : vector<16x56xf32>, vector<56x7xf32>, vector<16x7xf32> -> vector<16x7xf32>
    %c0_13 = arith.constant 0 : index
    %c0_14 = arith.constant 0 : index
    %18 = vector.load %arg5[%c0_13, %c0_14] : memref<2x16xf32, #tpu.memory_space<vmem>>, vector<2x16xf32>
    %cst_15 = arith.constant dense<0.000000e+00> : vector<2x7xf32>
    %19 = tpu.matmul %18, %17, %cst_15 {dimension_numbers = #tpu.dot_dimension_numbers<[1], [0], [0], [1], [0, 0, 1, 1], [], []>} : vector<2x16xf32>, vector<16x7xf32>, vector<2x7xf32> -> vector<2x7xf32>
    %c0_16 = arith.constant 0 : index
    %c0_17 = arith.constant 0 : index
    %20 = vector.load %arg7[%c0_16, %c0_17] : memref<1x7xf32, #tpu.memory_space<vmem>>, vector<1x7xf32>
    %21 = vector.broadcast %20 : vector<1x7xf32> to vector<2x7xf32>
    %22 = arith.addf %19, %21 : vector<2x7xf32>
    %cst_18 = arith.constant 0.000000e+00 : f32
    %23 = vector.broadcast %cst_18 : f32 to vector<2x7xf32>
    %24 = arith.maximumf %22, %23 : vector<2x7xf32>
    %c0_19 = arith.constant 0 : index
    %c0_20 = arith.constant 0 : index
    %25 = vector.load %arg8[%c0_19, %c0_20] : memref<2x7xf32, #tpu.memory_space<vmem>>, vector<2x7xf32>
    tpu.vector_store %arg8[%c0_19, %c0_20], %24 {strides = array<i32>} : memref<2x7xf32, #tpu.memory_space<vmem>>, vector<2x7xf32>,
    return
  }
}

</mosaic_0001>

<bundles_post_ra>
// kernel: tile.13
= control target key start
LH: loop header
LB: loop body
LE: loop exit
PB: predicated region body
PF: predicated region fallthrough
CT: control target
= control target key end

     0   :  { %s22_s0 = inlined_call_operand.vmem [shape: f32[8], index: 0, kind: input, shape index: {}]   ;;  %s23_s1 = inlined_call_operand.vmem [shape: f32[8,8], index: 1, kind: output, shape index: {}]  }
   0x1   :  { %v4_v0 = vld [vmem:[%s22_s0] ss:$0 sm:$0xff] }
   0x2   :  { %5 = vst [vmem:[%s23_s1] sm:$0xff] %v4_v0 }

// kernel: tile.14
= control target key start
LH: loop header
LB: loop body
LE: loop exit
PB: predicated region body
PF: predicated region fallthrough
CT: control target
= control target key end

     0   :  { %s67_s10 = smov 56   ;;  %s68_s11 = smov 40   ;;  %vm3_vm0 = vcmask 64512   ;;  %vm9_vm1 = vcmask 523712   ;;  %vm15_vm2 = vcmask 458112   ;;  %vm21_vm3 = vcmask 392512   ;;  %s111_s0 = inlined_call_operand.vmem [shape: f32[8,8], index: 0, kind: input, shape index: {}]   ;;  %s112_s1 = inlined_call_operand.vmem [shape: f32[64], index: 1, kind: output, shape index: {}]  }
   0x1   :  { %v53_v0 = vld [vmem:[%s111_s0 + $0x7] sm:$0x1]   ;;  %v55_v1 = vld [vmem:[%s111_s0 + $0x5] sm:$0x1]   ;;  %v54_v2 = vld [vmem:[%s111_s0 + $0x6] sm:$0x1]  }
   0x2   :  { %7 = vrot.lane.b32.xlu0 %v53_v0, %s67_s10  ;;  %19 = vrot.lane.b32.xlu1 %v55_v1, %s68_s11  ;;  %v56_v3 = vld [vmem:[%s111_s0 + $0x4] sm:$0x1]   ;;  %v2_v4 = vld [vmem:[%s111_s0] sm:$0x1]   ;;  %s69_s18 = smov 48   ;;  %s70_s19 = smov 32  }
   0x3   :  { %4 = vst.msk [vmem:[#allocation0] sm:$0x1] %vm3_vm0, %v2_v4   ;;  %v57_v5 = vld [vmem:[%s111_s0 + $0x3] sm:$0x1]   ;;  %v58_v6 = vld [vmem:[%s111_s0 + $0x2] sm:$0x1]  }
   0x4   :  { %s71_s24 = smov 24   ;;  %s72_s25 = smov 16   ;;  %v59_v7 = vld [vmem:[%s111_s0 + $0x1] sm:$0x1]   ;;  %vm27_vm4 = vcmask 326912   ;;  %vm33_vm5 = vcmask 261312  }
   0x5   :  { %s73_s0 = smov 8   ;;  %vm39_vm6 = vcmask 195712   ;;  %vm45_vm7 = vcmask 130112  }
   0x6   :  { %13 = vrot.lane.b32.xlu0 %v54_v2, %s69_s18  ;;  %25 = vrot.lane.b32.xlu1 %v56_v3, %s70_s19 }
   0xa   :  { %31 = vrot.lane.b32.xlu0 %v57_v5, %s71_s24  ;;  %37 = vrot.lane.b32.xlu1 %v58_v6, %s72_s25 }
   0xe   :  { %43 = vrot.lane.b32.xlu0 %v59_v7, %s73_s0 }
  0x74   :  { %v8_v8 = vpop.permute.xlu0 %7   ;;  %v20_v9 = vpop.permute.xlu1 %19  }
  0x75   :  { %10 = vst.msk [vmem:[#allocation0] sm:$0x1] %vm9_vm1, %v8_v8  }
  0x78   :  { %v14_v10 = vpop.permute.xlu0 %13   ;;  %v26_v11 = vpop.permute.xlu1 %25  }
  0x79   :  { %16 = vst.msk [vmem:[#allocation0] sm:$0x1] %vm15_vm2, %v14_v10  }
  0x7a   :  { %22 = vst.msk [vmem:[#allocation0] sm:$0x1] %vm21_vm3, %v20_v9  }
  0x7b   :  { %28 = vst.msk [vmem:[#allocation0] sm:$0x1] %vm27_vm4, %v26_v11  }
  0x7c   :  { %v32_v12 = vpop.permute.xlu0 %31   ;;  %v38_v13 = vpop.permute.xlu1 %37  }
  0x7d   :  { %34 = vst.msk [vmem:[#allocation0] sm:$0x1] %vm33_vm5, %v32_v12  }
  0x7e   :  { %40 = vst.msk [vmem:[#allocation0] sm:$0x1] %vm39_vm6, %v38_v13  }
  0x80   :  { %v44_v14 = vpop.permute.xlu0 %43  }
  0x81   :  { %46 = vst.msk [vmem:[#allocation0] sm:$0x1] %vm45_vm7, %v44_v14  }
  0x88   :  { %v50_v15 = vld [vmem:[#allocation0] sm:$0x1] }
  0x89   :  { %52 = vst [vmem:[%s112_s1] sm:$0x1] %v50_v15 }

// kernel: net_forward.1
= control target key start
LH: loop header
LB: loop body
LE: loop exit
PB: predicated region body
PF: predicated region fallthrough
CT: control target
= control target key end

     0   :  { %vm40_vm0 = vcmask 392192   ;;  %s773_s0 = inlined_call_operand.vmem [shape: f32[32,48], index: 0, kind: input, shape index: {}]   ;;  %s774_s1 = inlined_call_operand.vmem [shape: f32[48,128], index: 1, kind: input, shape index: {}]   ;;  %s775_s2 = inlined_call_operand.vmem [shape: f32[1,128], index: 2, kind: input, shape index: {}]   ;;  %s776_s3 = inlined_call_operand.vmem [shape: f32[64,56], index: 3, kind: input, shape index: {}]   ;;  %s777_s4 = inlined_call_operand.vmem [shape: f32[16,56], index: 4, kind: input, shape index: {}]   ;;  %s778_s5 = inlined_call_operand.vmem [shape: f32[2,16], index: 5, kind: input, shape index: {}]   ;;  %s779_s6 = inlined_call_operand.vmem [shape: f32[56,7], index: 6, kind: input, shape index: {}]   ;;  %s780_s7 = inlined_call_operand.vmem [shape: f32[1,7], index: 7, kind: input, shape index: {}]   ;;  %s781_s8 = inlined_call_operand.hbm [shape: f32[2,7], index: 8, kind: output, shape index: {}]  }
   0x1   :  { %v34_v0 = vld [vmem:[%s774_s1] sm:$0xff]  ;;  %v35_v1 = vld [vmem:[%s774_s1 + $0x8] sm:$0xff]  ;;  %v36_v2 = vld [vmem:[%s774_s1 + $0x10] sm:$0xff] }
   0x2   :  { %v545_v3 = vpack.c.bf16 %v35_v1, %v34_v0  ;;  %v37_v4 = vld [vmem:[%s774_s1 + $0x18] sm:$0xff]  ;;  %v38_v6 = vld [vmem:[%s774_s1 + $0x20] sm:$0xff]  ;;  %v39_v7 = vld [vmem:[%s774_s1 + $0x28] sm:$0xff] }
   0x3   :  { %v549_v5 = vpack.c.bf16 %v37_v4, %v36_v2  ;;  %v30_v8 = vld [vmem:[%s773_s0] sm:$0xff] }
   0x4   :  { %546 = vmatprep.subr.bf16.mxu0 %v545_v3  ;;  %496 = vmatprep.mubr.msk.f32.mxu0 %vm40_vm0, %v30_v8 }
   0x5   :  { %13 = vsyncpa [#allocation3], 0  ;;  %548 = vmatpush3.bf16.msra.mxu0 %v545_v3  ;;  %v553_v9 = vpack.c.bf16 %v39_v7, %v38_v6  ;;  %v31_v10 = vld [vmem:[%s773_s0 + $0x8] sm:$0xff]  ;;  %v32_v11 = vld [vmem:[%s773_s0 + $0x10] sm:$0xff]  ;;  %s617_s29 = smov 64   ;;  %vm167_vm1 = vcmask 523264  }
   0x6   :  { %550 = vmatprep.subr.bf16.mxu0 %v549_v5  ;;  %v33_v12 = vld [vmem:[%s773_s0 + $0x18] sm:$0xff]  ;;  %v159_v13 = vld [vmem:[%s776_s3] sm:$0xff]  ;;  %v160_v14 = vld [vmem:[%s776_s3 + $0x8] sm:$0xff]  ;;  %vm260_vm2 = vcmask 457728   ;;  %v618_v54 = vmov 0.0|0.0   ;;  %vm619_vm3 = vmmov 0  }
   0x7   :  { %v161_v15 = vld [vmem:[%s776_s3 + $0x10] sm:$0xff]  ;;  %v557_v16 = vpack.c.bf16 %v160_v14, %v159_v13  ;;  %v162_v17 = vld [vmem:[%s776_s3 + $0x18] sm:$0xff]  ;;  %v163_v19 = vld [vmem:[%s776_s3 + $0x20] sm:$0xff]  ;;  %v620_v55 = vmov 0.0   ;;  %vm350_vm4 = vcmask 130048   ;;  %s621_s14 = smov [#allocation2]  }
   0x8   :  { %v561_v18 = vpack.c.bf16 %v162_v17, %v161_v15  ;;  %v164_v20 = vld [vmem:[%s776_s3 + $0x28] sm:$0xff]  ;;  %v165_v22 = vld [vmem:[%s776_s3 + $0x30] sm:$0xff]  ;;  %v166_v23 = vld [vmem:[%s776_s3 + $0x38] sm:$0xff]  ;;  %s433_s15 = sshll.u32 %s621_s14, 4  ;;  %vm425_vm5 = vcmask 50176   ;;  %s434_s15 = int_to_ptr.vmem [resolvable:$true] %s433_s15 }
   0x9   :  { %552 = vmatpush3.bf16.msra.mxu0 %v549_v5  ;;  %558 = vmatprep.subr.bf16.mxu1 %v557_v16  ;;  %v565_v21 = vpack.c.bf16 %v164_v20, %v163_v19  ;;  %v569_v24 = vpack.c.bf16 %v166_v23, %v165_v22  ;;  %v253_v27 = vld [vmem:[%s779_s6] sm:$0xff]  ;;  %v254_v28 = vld [vmem:[%s779_s6 + $0x8] sm:$0xff]  ;;  %v255_v29 = vld [vmem:[%s779_s6 + $0x10] sm:$0xff]  ;;  %s593_s16 = scalar_lea.vmem %s434_s15, 32  ;;  %p598_p1 = scmp.lt.s32.totalorder %s434_s15, %s434_s15 }
   0xa   :  { %554 = vmatprep.subr.bf16.mxu0 %v553_v9  ;;  %560 = vmatpush3.bf16.msra.mxu1 %v557_v16  ;;  %v573_v31 = vpack.c.bf16 %v254_v28, %v253_v27  ;;  %v256_v32 = vld [vmem:[%s779_s6 + $0x18] sm:$0xff]  ;;  %v445_v34 = vld [vmem:[%s775_s2] ss:$0 sm:$0xff]  ;;  %v258_v38 = vld [vmem:[%s779_s6 + $0x28] sm:$0xff]  ;;  %p594_p0 = scmp.ne.s32.totalorder %s434_s15, %s593_s16  ;;  %p599_p2 = scmp.lt.s32.totalorder %s593_s16, %s593_s16 }
   0xb   :  { %562 = vmatprep.subr.bf16.mxu1 %v561_v18  ;;  %v577_v36 = vpack.c.bf16 %v256_v32, %v255_v29  ;;  %v257_v37 = vld [vmem:[%s779_s6 + $0x20] sm:$0xff]  ;;  %v259_v47 = vld [vmem:[%s779_s6 + $0x30] sm:$0xff]  ;;  %v250_v50 = vld [vmem:[%s777_s4 + $0x8] sm:$0xff] }
   0xc   :  { %v581_v41 = vpack.c.bf16 %v258_v38, %v257_v37  ;;  %v249_v48 = vld [vmem:[%s777_s4] sm:$0xff]  ;;  %p600_p3 = por %p599_p2, %p598_p1 }
   0xd   :  { %556 = vmatpush3.bf16.msra.mxu0 %v553_v9  ;;  %v342_v59 = vld [vmem:[%s778_s5] sm:$0x3] }
   0xe   :  { %564 = vmatpush3.bf16.msra.mxu1 %v561_v18  ;;  %574 = vmatprep.subr.bf16.mxu0 %v573_v31  ;;  %v450_v60 = vld [vmem:[%s780_s7] ss:$0 sm:$0xff]  ;;  %p601_p4 = pnand %p600_p3, %p594_p0 }
   0xf   :  { %566 = vmatprep.subr.bf16.mxu1 %v565_v21 }
  0x10   :  { %497 = vmatmul.mubr.msk.f32.vlgmr.msra.gmra.mrb[0].mxu0 %vm40_vm0, %v31_v10 }
  0x11   :  { %499 = vmatprep.mubr.msk.f32.mxu0 %vm40_vm0, %v32_v11  ;;  %576 = vmatpush3.bf16.msra.mxu0 %v573_v31 }
  0x12   :  { %568 = vmatpush3.bf16.msra.mxu1 %v565_v21  ;;  %578 = vmatprep.subr.bf16.mxu0 %v577_v36 }
  0x13   :  { %570 = vmatprep.subr.bf16.mxu1 %v569_v24 }
  0x14   :  { %500 = vmatmul.mubr.msk.f32.gmra.mrb[2].mxu0 %vm40_vm0, %v33_v12 }
  0x15   :  { %580 = vmatpush3.bf16.msra.mxu0 %v577_v36 }
  0x16   :  { %572 = vmatpush3.bf16.msra.mxu1 %v569_v24  ;;  %582 = vmatprep.subr.bf16.mxu0 %v581_v41 }
  0x17   :  { %585 = vmatprep.subr.bf16.mxu1 %v618_v54 }
  0x19   :  { %584 = vmatpush3.bf16.msra.mxu0 %v581_v41 }
  0x1a   :  { %533 = vmatprep.subr.mxu0 %v259_v47 }
  0x1d   :  { %534 = vmatpush3.msra.mxu0 %v259_v47 }
  0xe3   :  { %v498_v25 = vpop.f32.mrb[0].mxu0 }
  0xe4   :  { %v119_v26 = vpop.f32.mrb[1].mxu0 }
  0xe7   :  { %v501_v30 = vpop.f32.mrb[2].mxu0 }
  0xe8   :  { %v139_v33 = vmax.f32 %v498_v25, %v501_v30  ;;  %v129_v35 = vpop.f32.mrb[3].mxu0 }
  0xe9   :  { %v138_v39 = vmax.f32 %v119_v26, %v129_v35 }
  0xea   :  { %v148_v42 = vadd.f32 %v445_v34, %v139_v33 }
  0xeb   :  { %v147_v40 = vadd.f32 %v445_v34, %v138_v39 }
  0xed   :  { %151 = vrot.lane.b32.xlu0 %v147_v40, %s617_s29 }
  0xf1   :  { %153 = vrot.lane.b32.xlu0 %v148_v42, %s617_s29 }
 0x15f   :  { %v152_v43 = vpop.permute.xlu0 %151 }
 0x160   :  { %v157_v44 = vmax.f32 %v147_v40, %v152_v43 }
 0x162   :  { %518 = vmatprep.mubr.msk.f32.mxu1 %vm167_vm1, %v157_v44 }
 0x163   :  { %v154_v45 = vpop.permute.xlu0 %153 }
 0x164   :  { %v158_v46 = vmax.f32 %v148_v42, %v154_v45 }
 0x166   :  { %519 = vmatmul.mubr.msk.f32.vlgmr.msra.gmra.mrb[0].mxu1 %vm167_vm1, %v158_v46 }
 0x167   :  { %542 = vmatprep.mubr.msk.f32.mxu1 %vm619_vm3, %v620_v55 }
 0x239   :  { %v520_v49 = vpop.f32.mrb[0].mxu1 }
 0x23a   :  { %v240_v51 = vpop.f32.mrb[1].mxu1  ;;  %v252_v53 = vmul.f32 %v520_v49, %v250_v50 }
 0x23b   :  { %v251_v52 = vmul.f32 %v249_v48, %v240_v51 }
 0x23d   :  { %535 = vmatprep.mubr.msk.f32.mxu0 %vm260_vm2, %v251_v52 }
 0x23e   :  { %536 = vmatmul.mubr.msk.f32.vlgmr.msra.gmra.mrb[4].mxu0 %vm260_vm2, %v252_v53 }
 0x311   :  { %v537_v56 = vpop.f32.mrb[4].mxu0 }
 0x312   :  { %v333_v57 = vpop.f32.mrb[5].mxu0 }
 0x313   :  { %v586_v58 = vpack.c.bf16 %v537_v56, %v333_v57 }
 0x315   :  { %587 = vmatpush3.bf16.msra.mxu1 %v586_v58 }
 0x318   :  { %543 = vmatmul.mubr.msk.f32.vlgmr.msra.gmra.mrb[2].mxu1 %vm350_vm4, %v342_v59 }
 0x3eb   :  { %v420_v61 = vpop.f32.mrb[2].mxu1 }
 0x3ec   :  { %v421_v62 = vadd.f32 %v450_v60, %v420_v61  ;;  %v544_v63 = vpop.f32.mrb[3].mxu1 }
 0x3ee   :  { %v424_v0 = vmax.f32 %v421_v62, 0.0 }
 0x3f0   :  { %426 = vst.msk [vmem:[#allocation2] sm:$0x3] %vm425_vm5, %v424_v0 }
 0x3f1   :  { %604 = shalt.err (!%p601_p4)
}
 0x3f2   :  { %s605_s7 = scalar_lea.hbm %s781_s8, 32 }
 0x3f3   :  { %p606_p5 = scmp.ne.s32.totalorder %s781_s8, %s605_s7  ;;  %p609_p6 = scmp.lt.u32.totalorder %s605_s7, %s781_s8 }
 0x3f5   :  { %p611_p7 = pnand %p609_p6, %p606_p5 }
 0x3f7   :  { %614 = shalt.err (!%p611_p7)
}
 0x3f8   :  { %436 = dma.vmem_to_hbm [thread:$0]  %s434_s15, 32, %s781_s8, [#allocation3]  }
 0x3f9   :  { %615 = dma.done.wait [#allocation3], 32  }
 0x3fa   :  { %616 = vsyncadd [#allocation3], 4294967264 }
 0x3fb   :  { %440 = vsyncpa [#allocation3], 1 }

</bundles_post_ra>
